<compile_context>
chip_gen: v6e
topology: v6e:2x2x1
jax: 0.10.0
libtpu: 0.0.40
codegen_flags: <defaults>
</compile_context>

<pallas_src>
import jax
import jax.numpy as jnp
from jax import lax
from jax.experimental import pallas as pl
from jax.experimental.pallas import tpu as pltpu


_NEG_LARGE = -1e30  # sentinel for padded logit lanes (finite to avoid inf/nan quirks)


def _round_up(x, m):
    return (x + m - 1) // m * m


def gumbel_linear_kernel(x1_ref, state_ref, g_ref,
                         w1_ref, b1_ref,
                         w3g_ref, w3s_ref, b3_ref,
                         sig_ref, y_ref):
    # ---- layer 1: logits = cat(task, state) @ W1 + b1 (x1 pre-concatenated, bf16) ---
    logits = jnp.dot(x1_ref[...], w1_ref[...],
                     preferred_element_type=jnp.float32) + b1_ref[...]

    # ---- hard Gumbel-softmax: forward value is one_hot(argmax(logits + g)) ----------
    # Padded lanes of b1 were pre-filled with -1e30 host-side, so no in-kernel mask.
    z = logits + g_ref[...]
    col = lax.broadcasted_iota(jnp.int32, z.shape, 1)
    m = jnp.max(z, axis=-1, keepdims=True)
    first = jnp.min(jnp.where(z >= m, col, jnp.int32(z.shape[-1])),
                    axis=-1, keepdims=True)                   # first-index tie break
    signal = (col == first).astype(jnp.bfloat16)              # 0/1 exact in bf16
    sig_ref[...] = signal

    # ---- layer 3: y = cat(signal, state) @ W3 + b3  (split matmul) ------------------
    y = (jnp.dot(signal, w3g_ref[...], preferred_element_type=jnp.float32)
         + jnp.dot(state_ref[...], w3s_ref[...], preferred_element_type=jnp.float32)
         + b3_ref[...])
    y_ref[...] = y.astype(y_ref.dtype)


def gumbel_linear_forward(task, state, params, gumbel):
    """Returns (y_pred, signal) — matching module.forward() and module.signal."""
    B, T = task.shape
    B2, S = state.shape
    assert B == B2
    SIG = params["w1"].shape[1]          # w1: (task_size + state_size, signal_size)
    ACT = params["w3"].shape[1]          # w3: (signal_size + state_size, action_size)
    assert params["w1"].shape[0] == T + S
    assert params["w3"].shape[0] == SIG + S
    assert gumbel.shape == (B, SIG)

    f32, bf16 = jnp.float32, jnp.bfloat16

    SIG_P = _round_up(SIG, 128)          # lane-dense MXU N / unmasked output stores
    ACT_P = _round_up(ACT, 128)

    # Batch tiling: >= 2 tiles whenever B allows (feeds both v7x TensorCores); tiles
    # grow up to 512 rows for large B to amortize per-grid-step overhead.
    B8 = _round_up(B, 8)
    TB = max(8, min(512, _round_up(pl.cdiv(B8, 2), 8)))
    B_P = _round_up(B8, TB)

    def pad2(a, rows, cols, dtype):
        out = jnp.zeros((rows, cols), dtype)
        return out.at[:a.shape[0], :a.shape[1]].set(a.astype(dtype))

    # Merged layer-1 activation; bf16 cast done host-side (halves per-tile DMA bytes).
    x1 = pad2(jnp.concatenate([task, state], axis=1), B_P, T + S, bf16)
    state_p = pad2(state, B_P, S, bf16)
    g_p = pad2(gumbel, B_P, SIG_P, f32)  # padded lanes 0 (b1 padding carries the mask)

    # Weights: layer 1 un-split; layer 3 split (signal is produced in-kernel).
    w1 = pad2(params["w1"], T + S, SIG_P, bf16)
    b1 = jnp.full((1, SIG_P), _NEG_LARGE, f32).at[0, :SIG].set(params["b1"].astype(f32))
    w3g = pad2(params["w3"][:SIG], SIG_P, ACT_P, bf16)
    w3s = pad2(params["w3"][SIG:], S, ACT_P, bf16)
    b3 = pad2(params["b3"].reshape(1, -1), 1, ACT_P, f32)

    batch = lambda i: (i, 0)             # batch-tiled operands
    resident = lambda i: (0, 0)          # grid-invariant operands stay in VMEM
    single = pl.Buffered(1)              # don't double-buffer grid-invariant operands

    # VMEM budget: double-buffered per-tile operands + single-buffered residents.
    per_tile = (TB * (T + S) * 2 + TB * S * 2 + TB * SIG_P * 4     # x1, state, g
                + TB * SIG_P * 2 + TB * ACT_P * 4)                 # sig out, y out
    resident_bytes = ((T + S) * SIG_P * 2 + SIG_P * 4
                      + SIG_P * ACT_P * 2 + S * ACT_P * 2 + ACT_P * 4)
    vmem_need = 2 * per_tile + resident_bytes
    vmem_limit = int(min(64 * 1024 * 1024, max(32 * 1024 * 1024, 2 * vmem_need)))

    flops = 2 * B_P * ((T + S) * SIG_P + (SIG_P + S) * ACT_P)
    bytes_accessed = int(x1.size * 2 + state_p.size * 2 + g_p.size * 4
                         + w1.size * 2 + b1.size * 4 + w3g.size * 2 + w3s.size * 2
                         + b3.size * 4 + B_P * SIG_P * 2 + B_P * ACT_P * 4)

    sig_pad, y_pad = pl.pallas_call(
        gumbel_linear_kernel,
        out_shape=(jax.ShapeDtypeStruct((B_P, SIG_P), bf16),
                   jax.ShapeDtypeStruct((B_P, ACT_P), f32)),
        grid_spec=pltpu.PrefetchScalarGridSpec(
            num_scalar_prefetch=0,
            grid=(B_P // TB,),
            in_specs=[
                pl.BlockSpec((TB, T + S), batch),
                pl.BlockSpec((TB, S), batch),
                pl.BlockSpec((TB, SIG_P), batch),
                pl.BlockSpec((T + S, SIG_P), resident, pipeline_mode=single),
                pl.BlockSpec((1, SIG_P), resident, pipeline_mode=single),
                pl.BlockSpec((SIG_P, ACT_P), resident, pipeline_mode=single),
                pl.BlockSpec((S, ACT_P), resident, pipeline_mode=single),
                pl.BlockSpec((1, ACT_P), resident, pipeline_mode=single),
            ],
            out_specs=[
                pl.BlockSpec((TB, SIG_P), batch),
                pl.BlockSpec((TB, ACT_P), batch),
            ]),
        compiler_params=pltpu.CompilerParams(
            dimension_semantics=("parallel",),       # batch tiles split across TCs (v7x)
            vmem_limit_bytes=vmem_limit),
        cost_estimate=pl.CostEstimate(
            flops=flops, transcendentals=0, bytes_accessed=bytes_accessed),
    )(x1, state_p, g_p, w1, b1, w3g, w3s, b3)

    return y_pad[:B, :ACT], sig_pad[:B, :SIG].astype(f32)


def init_params(key, task_size, state_size, action_size, signal_size):
    """nn.Linear-style init: U(-1/sqrt(fan_in), 1/sqrt(fan_in)); weights stored (in, out)."""
    ks = jax.random.split(key, 4)

    def lin(kw, kb, fan_in, fan_out):
        bound = 1.0 / (fan_in ** 0.5)
        w = jax.random.uniform(kw, (fan_in, fan_out), jnp.float32, -bound, bound)
        b = jax.random.uniform(kb, (fan_out,), jnp.float32, -bound, bound)
        return w, b

    w1, b1 = lin(ks[0], ks[1], task_size + state_size, signal_size)
    w3, b3 = lin(ks[2], ks[3], signal_size + state_size, action_size)
    return {"w1": w1, "b1": b1, "w3": w3, "b3": b3}


def gumbel_linear_ref(task, state, params, gumbel):
    """Pure-JAX reference with the same bf16-operand / f32-accumulate matmuls."""
    sig_n = params["w1"].shape[1]
    x1 = jnp.concatenate([task, state], axis=1)
    logits = jnp.dot(x1.astype(jnp.bfloat16), params["w1"].astype(jnp.bfloat16),
                     preferred_element_type=jnp.float32) + params["b1"]
    signal = jax.nn.one_hot(jnp.argmax(logits + gumbel, axis=-1), sig_n,
                            dtype=jnp.float32)
    x2 = jnp.concatenate([signal, state], axis=1)
    y = jnp.dot(x2.astype(jnp.bfloat16), params["w3"].astype(jnp.bfloat16),
                preferred_element_type=jnp.float32) + params["b3"]
    return y, signal


if __name__ == "__main__":
    key = jax.random.PRNGKey(0)
    kp, kt, ks, kg = jax.random.split(key, 4)

    B = 8
    task_size, state_size, action_size, signal_size = 6, 10, 5, 4
    # hidden_size is an unused constructor arg of the module; not needed here.
    # TODO(synk): self.dropout is defined but never applied in forward(); omitted.

    params = init_params(kp, task_size, state_size, action_size, signal_size)
    task = jax.random.normal(kt, (B, task_size), jnp.float32)
    state = jax.random.normal(ks, (B, state_size), jnp.float32)
    # Gumbel(0,1) noise for the hard gumbel-softmax, sampled host-side.
    gumbel = jax.random.gumbel(kg, (B, signal_size), jnp.float32)

    y, signal = gumbel_linear_forward(task, state, params, gumbel)
    y = jax.block_until_ready(y)
    signal = jax.block_until_ready(signal)

    y_ref, sig_ref = gumbel_linear_ref(task, state, params, gumbel)

    assert y.shape == (B, action_size)
    assert signal.shape == (B, signal_size)
    assert jnp.allclose(jnp.sum(signal, axis=-1), 1.0), "signal is not one-hot"
    assert jnp.array_equal(signal, sig_ref), "gumbel-softmax one-hot mismatch"
    assert jnp.allclose(y, y_ref, atol=2e-3, rtol=2e-3), "y_pred mismatch"

    print("KERNEL_OK")
</pallas_src>

<mosaic_0001>
module attributes {stable_mosaic.version = 11 : i64} {
  func.func @gumbel_linear_kernel(%arg0: i32, %arg1: memref<8x16xbf16, #tpu.memory_space<vmem>>, %arg2: memref<8x10xbf16, #tpu.memory_space<vmem>>, %arg3: memref<8x128xf32, #tpu.memory_space<vmem>>, %arg4: memref<16x128xbf16, #tpu.memory_space<vmem>>, %arg5: memref<1x128xf32, #tpu.memory_space<vmem>>, %arg6: memref<128x128xbf16, #tpu.memory_space<vmem>>, %arg7: memref<10x128xbf16, #tpu.memory_space<vmem>>, %arg8: memref<1x128xf32, #tpu.memory_space<vmem>>, %arg9: memref<8x128xbf16, #tpu.memory_space<vmem>>, %arg10: memref<8x128xf32, #tpu.memory_space<vmem>>) attributes {dimension_semantics = [#tpu.dimension_semantics<parallel>], iteration_bounds = array<i64: 1>, scalar_prefetch = 0 : i64, scratch_operands = 0 : i64, tpu.core_type = #tpu.core_type<tc>, window_params = [{transform_indices = @transform_0, window_bounds = array<i64: 8, 16>}, {transform_indices = @transform_1, window_bounds = array<i64: 8, 10>}, {transform_indices = @transform_2, window_bounds = array<i64: 8, 128>}, {pipeline_mode = #tpu.pipeline_mode<synchronous>, transform_indices = @transform_3, window_bounds = array<i64: 16, 128>}, {pipeline_mode = #tpu.pipeline_mode<synchronous>, transform_indices = @transform_4, window_bounds = array<i64: 1, 128>}, {pipeline_mode = #tpu.pipeline_mode<synchronous>, transform_indices = @transform_5, window_bounds = array<i64: 128, 128>}, {pipeline_mode = #tpu.pipeline_mode<synchronous>, transform_indices = @transform_6, window_bounds = array<i64: 10, 128>}, {pipeline_mode = #tpu.pipeline_mode<synchronous>, transform_indices = @transform_7, window_bounds = array<i64: 1, 128>}, {transform_indices = @transform_8, window_bounds = array<i64: 8, 128>}, {transform_indices = @transform_9, window_bounds = array<i64: 8, 128>}]} {
    %c0 = arith.constant 0 : index
    %c0_0 = arith.constant 0 : index
    %0 = vector.load %arg1[%c0, %c0_0] : memref<8x16xbf16, #tpu.memory_space<vmem>>, vector<8x16xbf16>
    %c0_1 = arith.constant 0 : index
    %c0_2 = arith.constant 0 : index
    %1 = vector.load %arg4[%c0_1, %c0_2] : memref<16x128xbf16, #tpu.memory_space<vmem>>, vector<16x128xbf16>
    %cst = arith.constant dense<0.000000e+00> : vector<8x128xf32>
    %2 = tpu.matmul %0, %1, %cst {dimension_numbers = #tpu.dot_dimension_numbers<[1], [0], [0], [1], [0, 0, 1, 1], [], []>} : vector<8x16xbf16>, vector<16x128xbf16>, vector<8x128xf32> -> vector<8x128xf32>
    %c0_3 = arith.constant 0 : index
    %c0_4 = arith.constant 0 : index
    %3 = vector.load %arg5[%c0_3, %c0_4] : memref<1x128xf32, #tpu.memory_space<vmem>>, vector<1x128xf32>
    %4 = vector.broadcast %3 : vector<1x128xf32> to vector<8x128xf32>
    %5 = arith.addf %2, %4 : vector<8x128xf32>
    %c0_5 = arith.constant 0 : index
    %c0_6 = arith.constant 0 : index
    %6 = vector.load %arg3[%c0_5, %c0_6] : memref<8x128xf32, #tpu.memory_space<vmem>>, vector<8x128xf32>
    %7 = arith.addf %5, %6 : vector<8x128xf32>
    %8 = tpu.iota {dimensions = array<i32: 1>} : vector<8x128xi32>
    %cst_7 = arith.constant dense<0xFF800000> : vector<8xf32>
    %9 = vector.multi_reduction <maximumf>, %7, %cst_7 [1] : vector<8x128xf32> to vector<8xf32>
    %10 = vector.shape_cast %9 : vector<8xf32> to vector<8x1xf32>
    %11 = vector.broadcast %10 : vector<8x1xf32> to vector<8x128xf32>
    %12 = arith.cmpf oge, %7, %11 : vector<8x128xf32>
    %c128_i32 = arith.constant 128 : i32
    %13 = vector.broadcast %c128_i32 : i32 to vector<8x128xi32>
    %14 = arith.select %12, %8, %13 : vector<8x128xi1>, vector<8x128xi32>
    %cst_8 = arith.constant dense<2147483647> : vector<8xi32>
    %15 = vector.multi_reduction <minsi>, %14, %cst_8 [1] : vector<8x128xi32> to vector<8xi32>
    %16 = vector.shape_cast %15 : vector<8xi32> to vector<8x1xi32>
    %17 = vector.broadcast %16 : vector<8x1xi32> to vector<8x128xi32>
    %18 = arith.cmpi eq, %8, %17 : vector<8x128xi32>
    %19 = arith.extui %18 : vector<8x128xi1> to vector<8x128xi32>
    %20 = arith.sitofp %19 : vector<8x128xi32> to vector<8x128xf32>
    %21 = arith.truncf %20 : vector<8x128xf32> to vector<8x128xbf16>
    %c0_9 = arith.constant 0 : index
    %c0_10 = arith.constant 0 : index
    %22 = vector.load %arg9[%c0_9, %c0_10] : memref<8x128xbf16, #tpu.memory_space<vmem>>, vector<8x128xbf16>
    tpu.vector_store %arg9[%c0_9, %c0_10], %21 {strides = array<i32>} : memref<8x128xbf16, #tpu.memory_space<vmem>>, vector<8x128xbf16>,
    %c0_11 = arith.constant 0 : index
    %c0_12 = arith.constant 0 : index
    %23 = vector.load %arg6[%c0_11, %c0_12] : memref<128x128xbf16, #tpu.memory_space<vmem>>, vector<128x128xbf16>
    %cst_13 = arith.constant dense<0.000000e+00> : vector<8x128xf32>
    %24 = tpu.matmul %21, %23, %cst_13 {dimension_numbers = #tpu.dot_dimension_numbers<[1], [0], [0], [1], [0, 0, 1, 1], [], []>} : vector<8x128xbf16>, vector<128x128xbf16>, vector<8x128xf32> -> vector<8x128xf32>
    %c0_14 = arith.constant 0 : index
    %c0_15 = arith.constant 0 : index
    %25 = vector.load %arg2[%c0_14, %c0_15] : memref<8x10xbf16, #tpu.memory_space<vmem>>, vector<8x10xbf16>
    %c0_16 = arith.constant 0 : index
    %c0_17 = arith.constant 0 : index
    %26 = vector.load %arg7[%c0_16, %c0_17] : memref<10x128xbf16, #tpu.memory_space<vmem>>, vector<10x128xbf16>
    %cst_18 = arith.constant dense<0.000000e+00> : vector<8x128xf32>
    %27 = tpu.matmul %25, %26, %cst_18 {dimension_numbers = #tpu.dot_dimension_numbers<[1], [0], [0], [1], [0, 0, 1, 1], [], []>} : vector<8x10xbf16>, vector<10x128xbf16>, vector<8x128xf32> -> vector<8x128xf32>
    %28 = arith.addf %24, %27 : vector<8x128xf32>
    %c0_19 = arith.constant 0 : index
    %c0_20 = arith.constant 0 : index
    %29 = vector.load %arg8[%c0_19, %c0_20] : memref<1x128xf32, #tpu.memory_space<vmem>>, vector<1x128xf32>
    %30 = vector.broadcast %29 : vector<1x128xf32> to vector<8x128xf32>
    %31 = arith.addf %28, %30 : vector<8x128xf32>
    %c0_21 = arith.constant 0 : index
    %c0_22 = arith.constant 0 : index
    %32 = vector.load %arg10[%c0_21, %c0_22] : memref<8x128xf32, #tpu.memory_space<vmem>>, vector<8x128xf32>
    tpu.vector_store %arg10[%c0_21, %c0_22], %31 {strides = array<i32>} : memref<8x128xf32, #tpu.memory_space<vmem>>, vector<8x128xf32>,
    return
  }
  func.func @transform_0(%arg0: i32) -> (i32, i32) {
    %c0_i32 = arith.constant 0 : i32
    %c0_i32_0 = arith.constant 0 : i32
    return %arg0, %c0_i32 : i32, i32
  }
  func.func @transform_1(%arg0: i32) -> (i32, i32) {
    %c0_i32 = arith.constant 0 : i32
    %c0_i32_0 = arith.constant 0 : i32
    return %arg0, %c0_i32 : i32, i32
  }
  func.func @transform_2(%arg0: i32) -> (i32, i32) {
    %c0_i32 = arith.constant 0 : i32
    %c0_i32_0 = arith.constant 0 : i32
    return %arg0, %c0_i32 : i32, i32
  }
  func.func @transform_3(%arg0: i32) -> (i32, i32) {
    %c0_i32 = arith.constant 0 : i32
    %c0_i32_0 = arith.constant 0 : i32
    %c0_i32_1 = arith.constant 0 : i32
    return %c0_i32, %c0_i32_0 : i32, i32
  }
  func.func @transform_4(%arg0: i32) -> (i32, i32) {
    %c0_i32 = arith.constant 0 : i32
    %c0_i32_0 = arith.constant 0 : i32
    %c0_i32_1 = arith.constant 0 : i32
    return %c0_i32, %c0_i32_0 : i32, i32
  }
  func.func @transform_5(%arg0: i32) -> (i32, i32) {
    %c0_i32 = arith.constant 0 : i32
    %c0_i32_0 = arith.constant 0 : i32
    %c0_i32_1 = arith.constant 0 : i32
    return %c0_i32, %c0_i32_0 : i32, i32
  }
  func.func @transform_6(%arg0: i32) -> (i32, i32) {
    %c0_i32 = arith.constant 0 : i32
    %c0_i32_0 = arith.constant 0 : i32
    %c0_i32_1 = arith.constant 0 : i32
    return %c0_i32, %c0_i32_0 : i32, i32
  }
  func.func @transform_7(%arg0: i32) -> (i32, i32) {
    %c0_i32 = arith.constant 0 : i32
    %c0_i32_0 = arith.constant 0 : i32
    %c0_i32_1 = arith.constant 0 : i32
    return %c0_i32, %c0_i32_0 : i32, i32
  }
  func.func @transform_8(%arg0: i32) -> (i32, i32) {
    %c0_i32 = arith.constant 0 : i32
    %c0_i32_0 = arith.constant 0 : i32
    return %arg0, %c0_i32 : i32, i32
  }
  func.func @transform_9(%arg0: i32) -> (i32, i32) {
    %c0_i32 = arith.constant 0 : i32
    %c0_i32_0 = arith.constant 0 : i32
    return %arg0, %c0_i32 : i32, i32
  }
}

</mosaic_0001>

<bundles_post_ra>
// kernel: tpu_custom_call.1
= control target key start
LH: loop header
LB: loop body
LE: loop exit
PB: predicated region body
PF: predicated region fallthrough
CT: control target
= control target key end

     0   :  { %15 = vsyncpa [#allocation3], 0  ;;  %s729_s0 = inlined_call_operand.hbm [shape: bf16[8,16], index: 0, kind: input, shape index: {}]   ;;  %s730_s1 = inlined_call_operand.hbm [shape: bf16[8,10], index: 1, kind: input, shape index: {}]   ;;  %s731_s2 = inlined_call_operand.hbm [shape: f32[8,128], index: 2, kind: input, shape index: {}]   ;;  %s732_s3 = inlined_call_operand.hbm [shape: bf16[16,128], index: 3, kind: input, shape index: {}]   ;;  %s733_s4 = inlined_call_operand.vmem [shape: f32[1,128], index: 4, kind: input, shape index: {}]   ;;  %s734_s5 = inlined_call_operand.hbm [shape: bf16[128,128], index: 5, kind: input, shape index: {}]   ;;  %s735_s6 = inlined_call_operand.vmem [shape: bf16[10,128], index: 6, kind: input, shape index: {}]   ;;  %s736_s7 = inlined_call_operand.vmem [shape: f32[1,128], index: 7, kind: input, shape index: {}]   ;;  %s737_s8 = inlined_call_operand.hbm [shape: bf16[8,128], index: 8, kind: output, shape index: {0}]   ;;  %s738_s9 = inlined_call_operand.hbm [shape: f32[8,128], index: 9, kind: output, shape index: {1}]  }
   0x1   :  { %16 = vsyncpa [#allocation6], 0 }
   0x2   :  { %17 = vsyncpa [#allocation9], 0 }
   0x3   :  { %18 = vsyncpa [#allocation4], 0 }
   0x4   :  { %19 = vsyncpa [#allocation13], 0  ;;  %s617_s30 = smov [#allocation5]   ;;  %s618_s11 = smov [#allocation8]  }
   0x5   :  { %s36_s10 = sshll.u32 %s617_s30, 4  ;;  %s55_s12 = sshll.u32 %s618_s11, 4  ;;  %s37_s10 = int_to_ptr.vmem [resolvable:$true] %s36_s10  ;;  %s56_s12 = int_to_ptr.vmem [resolvable:$true] %s55_s12 }
   0x6   :  { %s475_s13 = scalar_lea.vmem %s37_s10, 64  ;;  %p480_p1 = scmp.lt.s32.totalorder %s37_s10, %s37_s10 }
   0x7   :  { %p476_p0 = scmp.ne.s32.totalorder %s37_s10, %s475_s13  ;;  %p481_p2 = scmp.lt.s32.totalorder %s475_s13, %s475_s13 }
   0x9   :  { %p482_p3 = por %p481_p2, %p480_p1 }
   0xb   :  { %p483_p4 = pnand %p482_p3, %p476_p0 }
   0xd   :  { %486 = shalt.err (!%p483_p4)
}
   0xe   :  { %39 = dma.hbm_to_vmem [thread:$0]  %s730_s1, 64, %s37_s10, [#allocation6]  }
   0xf   :  { %s495_s16 = scalar_lea.vmem %s56_s12, 128  ;;  %p500_p6 = scmp.lt.s32.totalorder %s56_s12, %s56_s12 }
  0x10   :  { %p496_p5 = scmp.ne.s32.totalorder %s56_s12, %s495_s16  ;;  %p501_p7 = scmp.lt.s32.totalorder %s495_s16, %s495_s16 }
  0x12   :  { %p502_p8 = por %p501_p7, %p500_p6 }
  0x14   :  { %p503_p9 = pnand %p502_p8, %p496_p5 }
  0x16   :  { %506 = shalt.err (!%p503_p9)
}
  0x17   :  { %s619_s17 = smov 64   ;;  %s620_s18 = smov 4  }
  0x18   :  { %61 = dma.hbm_to_vmem [thread:$0]  %s732_s3, 128, %s56_s12, [#allocation9], %s619_s17, %s619_s17, %s620_s18  }
  0x19   :  { %s621_s21 = smov [#allocation2]   ;;  %s622_s23 = smov [#allocation7]  }
  0x1a   :  { %s26_s22 = sshll.u32 %s621_s21, 4  ;;  %s46_s1 = sshll.u32 %s622_s23, 4  ;;  %s27_s22 = int_to_ptr.vmem [resolvable:$true] %s26_s22  ;;  %s47_s1 = int_to_ptr.vmem [resolvable:$true] %s46_s1 }
  0x1b   :  { %s515_s24 = scalar_lea.vmem %s27_s22, 64  ;;  %p520_p11 = scmp.lt.s32.totalorder %s27_s22, %s27_s22 }
  0x1c   :  { %p516_p10 = scmp.ne.s32.totalorder %s27_s22, %s515_s24  ;;  %p521_p12 = scmp.lt.s32.totalorder %s515_s24, %s515_s24 }
  0x1e   :  { %p522_p13 = por %p521_p12, %p520_p11 }
  0x20   :  { %p523_p0 = pnand %p522_p13, %p516_p10 }
  0x22   :  { %526 = shalt.err (!%p523_p0)
}
  0x23   :  { %29 = dma.hbm_to_vmem [thread:$0]  %s729_s0, 64, %s27_s22, [#allocation3]  }
  0x24   :  { %s535_s27 = scalar_lea.vmem %s47_s1, 128  ;;  %p540_p2 = scmp.lt.s32.totalorder %s47_s1, %s47_s1 }
  0x25   :  { %p536_p1 = scmp.ne.s32.totalorder %s47_s1, %s535_s27  ;;  %p541_p3 = scmp.lt.s32.totalorder %s535_s27, %s535_s27 }
  0x27   :  { %p542_p4 = por %p541_p3, %p540_p2 }
  0x29   :  { %p543_p5 = pnand %p542_p4, %p536_p1 }
  0x2b   :  { %546 = shalt.err (!%p543_p5)
}
  0x2c   :  { %49 = dma.hbm_to_vmem [thread:$0]  %s731_s2, 128, %s47_s1, [#allocation6]  }
  0x2d   :  { %s623_s29 = smov [#allocation10]  }
  0x2e   :  { %s69_s30 = sshll.u32 %s623_s29, 4  ;;  %s70_s30 = int_to_ptr.vmem [resolvable:$true] %s69_s30 }
  0x2f   :  { %s555_s10 = scalar_lea.vmem %s70_s30, 1024  ;;  %p560_p7 = scmp.lt.s32.totalorder %s70_s30, %s70_s30 }
  0x30   :  { %p556_p6 = scmp.ne.s32.totalorder %s70_s30, %s555_s10  ;;  %p561_p8 = scmp.lt.s32.totalorder %s555_s10, %s555_s10 }
  0x32   :  { %p562_p9 = por %p561_p8, %p560_p7 }
  0x34   :  { %p563_p10 = pnand %p562_p9, %p556_p6 }
  0x36   :  { %566 = shalt.err (!%p563_p10)
}
  0x37   :  { %75 = dma.hbm_to_vmem [thread:$0]  %s734_s5, 1024, %s70_s30, [#allocation9], %s619_s17, %s619_s17, %s620_s18  }
  0x38   :  { %607 = dma.done.wait [#allocation3], 64  }
  0x39   :  { %608 = vsyncadd [#allocation3], 4294967232 }
  0x3a   :  { %609 = dma.done.wait [#allocation6], 192  }
  0x3b   :  { %610 = vsyncadd [#allocation6], 4294967104 }
  0x3c   :  { %611 = dma.done.wait [#allocation9], 1152  }
  0x3d   :  { %612 = vsyncadd [#allocation9], 4294966144  ;;  %v624_v0 = vmov 0.0   ;;  %vm625_vm0 = vmmov 0   ;;  %v457_v1 = vld [vmem:[#allocation8] sm:$0xff]   ;;  %vm112_vm1 = vcmask 130048   ;;  %v158_v11 = vlaneseq }
  0x3e   :  { %413 = vmatprep.subr.bf16.mxu1 %v624_v0  ;;  %415 = vmatprep.mubr.msk.bf16.mxu1 %vm625_vm0, %v624_v0  ;;  %v96_v2 = vld [vmem:[#allocation2] sm:$0xf]  ;;  %v383_v3 = vld [vmem:[%s733_s4] ss:$0 sm:$0xff]  ;;  %v156_v5 = vld [vmem:[#allocation7] sm:$0xff]  ;;  %vm211_vm3 = vcmask 1044480  }
  0x3f   :  { %425 = vmatprep.subr.bf16.mxu0 %v624_v0  ;;  %441 = vmatprep.mubr.msk.bf16.mxu0 %vm625_vm0, %v624_v0  ;;  %v159_v12 = vand.u32 127, %v158_v11  ;;  %v458_v17 = vld [vmem:[#allocation10 + $0x38] sm:$0xff]   ;;  %v459_v18 = vld [vmem:[#allocation10 + $0x30] sm:$0xff]   ;;  %v464_v19 = vld [vmem:[%s735_s6] sm:$0x1f]   ;;  %vm207_vm5 = vcmask 80896  }
  0x40   :  { %414 = vmatpush3.bf16.msra.mxu1 %v457_v1  ;;  %426 = vmatpush3.bf16.msra.mxu0 %v458_v17  ;;  %v213_v20 = vsel %vm211_vm3, %v464_v19, 0  ;;  %v460_v21 = vld [vmem:[#allocation10 + $0x28] sm:$0xff]   ;;  %v461_v22 = vld [vmem:[#allocation10 + $0x20] sm:$0xff]   ;;  %v462_v23 = vld [vmem:[#allocation10 + $0x18] sm:$0xff]   ;;  %v626_v38 = vmov 1.0|1.0  }
  0x41   :  { %419 = vmatprep.subr.bf16.mxu1 %v624_v0  ;;  %427 = vmatprep.subr.bf16.mxu0 %v624_v0  ;;  %v463_v24 = vld [vmem:[#allocation10 + $0x10] sm:$0xff]   ;;  %v465_v25 = vld [vmem:[#allocation10 + $0x8] sm:$0xff]   ;;  %v466_v31 = vld [vmem:[#allocation10] sm:$0xff]   ;;  %s627_s6 = smov [#allocation11]  }
  0x42   :  { %v199_v30 = vld [vmem:[#allocation5] sm:$0xf]  ;;  %s358_s13 = sshll.u32 %s627_s6, 4  ;;  %s359_s13 = int_to_ptr.vmem [resolvable:$true] %s358_s13 }
  0x43   :  { %416 = vmatmul.mubr.msk.bf16.vlgmr.msra.gmra.mxu1 %vm112_vm1, %v96_v2  ;;  %s567_s14 = scalar_lea.vmem %s359_s13, 64  ;;  %p572_p12 = scmp.lt.s32.totalorder %s359_s13, %s359_s13 }
  0x44   :  { %421 = vmatprep.mubr.msk.bf16.mxu1 %vm625_vm0, %v624_v0  ;;  %420 = vmatpush3.bf16.msra.mxu1 %v213_v20  ;;  %p568_p11 = scmp.ne.s32.totalorder %s359_s13, %s567_s14  ;;  %p573_p13 = scmp.lt.s32.totalorder %s567_s14, %s567_s14 }
  0x45   :  { %428 = vmatpush3.bf16.msra.mxu0 %v459_v18 }
  0x46   :  { %429 = vmatprep.subr.bf16.mxu0 %v624_v0  ;;  %p574_p0 = por %p573_p13, %p572_p12 }
  0x48   :  { %p575_p1 = pnand %p574_p0, %p568_p11 }
  0x49   :  { %430 = vmatpush3.bf16.msra.mxu0 %v460_v21 }
  0x4a   :  { %431 = vmatprep.subr.bf16.mxu0 %v624_v0 }
  0x4b   :  { %422 = vmatmul.mubr.msk.bf16.vlgmr.msra.gmra.mxu1 %vm207_vm5, %v199_v30 }
  0x4d   :  { %432 = vmatpush3.bf16.msra.mxu0 %v461_v22 }
  0x4e   :  { %433 = vmatprep.subr.bf16.mxu0 %v624_v0 }
  0x51   :  { %434 = vmatpush3.bf16.msra.mxu0 %v462_v23 }
  0x52   :  { %435 = vmatprep.subr.bf16.mxu0 %v624_v0 }
  0x55   :  { %436 = vmatpush3.bf16.msra.mxu0 %v463_v24 }
  0x56   :  { %437 = vmatprep.subr.bf16.mxu0 %v624_v0 }
  0x59   :  { %438 = vmatpush3.bf16.msra.mxu0 %v465_v25 }
  0x5a   :  { %439 = vmatprep.subr.bf16.mxu0 %v624_v0 }
  0x5d   :  { %440 = vmatpush3.bf16.msra.mxu0 %v466_v31 }
 0x103   :  { %v150_v4 = vpop.f32.mrf.mxu1 }
 0x104   :  { %v151_v6 = vadd.f32 %v383_v3, %v150_v4 }
 0x105   :  { %v417_v7 = vpop.f32.mrf.mxu1 }
 0x106   :  { %v157_v8 = vadd.f32 %v156_v5, %v151_v6 }
 0x107   :  { %v153_v9 = vpop.f32.mrf.mxu1 }
 0x108   :  { %160 = vmax.xlane.f32.xlu0 %v157_v8 }
 0x109   :  { %v418_v10 = vpop.f32.mrf.mxu1 }
 0x10b   :  { %v249_v40 = vpop.f32.mrf.mxu1 }
 0x10d   :  { %v423_v41 = vpop.f32.mrf.mxu1 }
 0x10f   :  { %v252_v42 = vpop.f32.mrf.mxu1 }
 0x111   :  { %v424_v43 = vpop.f32.mrf.mxu1 }
 0x191   :  { %v161_v13 = vpop.xlane.xlu0 %160 }
 0x192   :  { %vm162_vm2 = vcmp.ge.f32.partialorder %v157_v8, %v161_v13 }
 0x193   :  { %v163_v14 = vsel %vm162_vm2, %v159_v12, 128 }
 0x194   :  { %v165_v15 = vshra.s32 %v163_v14, 16  ;;  %v164_v26 = vand.u32 65535, %v163_v14 }
 0x196   :  { %v167_v16 = vcvt.s32.f32 %v165_v15  ;;  %v166_v28 = vcvt.s32.f32 %v164_v26 }
 0x198   :  { %168 = vmin.xlane.f32.xlu0 %v167_v16 }
 0x221   :  { %v169_v27 = vpop.xlane.xlu0 %168 }
 0x222   :  { %vm170_vm4 = vcmp.eq.f32.partialorder %v167_v16, %v169_v27  ;;  %v175_v32 = vcvt.f32.s32 %v169_v27 }
 0x223   :  { %v171_v29 = vsel %vm170_vm4, %v166_v28, inf }
 0x224   :  { %172 = vmin.xlane.f32.xlu1 %v171_v29  ;;  %v176_v34 = vshll.u32 %v175_v32, 16 }
 0x2ad   :  { %v173_v33 = vpop.xlane.xlu1 %172 }
 0x2ae   :  { %v174_v35 = vcvt.f32.s32 %v173_v33 }
 0x2b0   :  { %v177_v36 = vadd.s32 %v176_v34, %v174_v35 }
 0x2b2   :  { %vm178_vm6 = vcmp.eq.s32.totalorder %v159_v12, %v177_v36 }
 0x2b3   :  { %vm397_vm7 = vmpackc.low %vm178_vm6, %vm178_vm6  ;;  %v386_v37 = vsel %vm178_vm6, 1.0, %v624_v0 }
 0x2b4   :  { %442 = vmatmul.mubr.msk.bf16.vlgmr.msra.gmra.mxu0 %vm397_vm7, %v626_v38  ;;  %v181_v39 = vpack.c.bf16 %v386_v37, %v386_v37 }
 0x2b6   :  { %182 = vst [vmem:[#allocation11] sm:$0xf] %v181_v39 }
 0x2b7   :  { %578 = shalt.err (!%p575_p1)
}
 0x2b8   :  { %361 = dma.vmem_to_hbm [thread:$0]  %s359_s13, 64, %s737_s8, [#allocation4]   ;;  %v399_v45 = vld [vmem:[%s736_s7] ss:$0 sm:$0xff] }
 0x2b9   :  { %s628_s19 = smov [#allocation12]  }
 0x2ba   :  { %s368_s20 = sshll.u32 %s628_s19, 4  ;;  %s369_s20 = int_to_ptr.vmem [resolvable:$true] %s368_s20 }
 0x2bb   :  { %s587_s21 = scalar_lea.vmem %s369_s20, 128  ;;  %p592_p3 = scmp.lt.s32.totalorder %s369_s20, %s369_s20 }
 0x2bc   :  { %p588_p2 = scmp.ne.s32.totalorder %s369_s20, %s587_s21  ;;  %p593_p4 = scmp.lt.s32.totalorder %s587_s21, %s587_s21 }
 0x2be   :  { %p594_p5 = por %p593_p4, %p592_p3 }
 0x2c0   :  { %p595_p6 = pnand %p594_p5, %p588_p2 }
 0x374   :  { %v337_v44 = vpop.f32.mrf.mxu0 }
 0x375   :  { %v338_v46 = vadd.f32 %v337_v44, %v249_v40 }
 0x376   :  { %v443_v47 = vpop.f32.mrf.mxu0 }
 0x377   :  { %v350_v48 = vadd.f32 %v399_v45, %v338_v46 }
 0x378   :  { %v340_v49 = vpop.f32.mrf.mxu0 }
 0x379   :  { %351 = vst [vmem:[#allocation12] sm:$0xff] %v350_v48 }
 0x37a   :  { %v444_v50 = vpop.f32.mrf.mxu0 }
 0x37b   :  { %598 = shalt.err (!%p595_p6)
}
 0x37c   :  { %371 = dma.vmem_to_hbm [thread:$0]  %s369_s20, 128, %s738_s9, [#allocation13]  }
 0x37d   :  { %613 = dma.done.wait [#allocation4], 64  }
 0x37e   :  { %614 = vsyncadd [#allocation4], 4294967232 }
 0x37f   :  { %615 = dma.done.wait [#allocation13], 128  }
 0x380   :  { %616 = vsyncadd [#allocation13], 4294967168 }
 0x381   :  { %378 = vsyncpa [#allocation3], 1 }
 0x382   :  { %379 = vsyncpa [#allocation6], 1 }
 0x383   :  { %380 = vsyncpa [#allocation9], 1 }
 0x384   :  { %381 = vsyncpa [#allocation4], 1 }
 0x385   :  { %382 = vsyncpa [#allocation13], 1 }

</bundles_post_ra>
